<compile_context>
chip_gen: v7x
topology: tpu7x:2x2x1
jax: 0.10.0
libtpu: 0.0.40
codegen_flags: <defaults>
</compile_context>

<pallas_src>
import functools

import jax
import jax.numpy as jnp
from jax.experimental import pallas as pl
from jax.experimental.pallas import tpu as pltpu


def _lookahead_kernel(x_cur_ref, x_halo_ref, w_ref, o_ref, xext_ref, acc_ref,
                      *, context, t_total, t_tile, mask_cur):
    # x_cur_ref : (TT, LT)        current time tile
    # x_halo_ref: (H,  LT)        head of the next time tile (H >= context-1)
    # w_ref     : (C,  LT)        depthwise taps, already replicated over batch
    # o_ref     : (TT, LT)
    # xext_ref  : (TT+C-1, LT) f32 scratch (staged, masked, cast input)
    # acc_ref   : (TT, LT)     f32 scratch accumulator
    C = context
    TT = t_tile
    it = pl.program_id(1)  # time-tile index; grid = (lane_tiles, time_tiles)

    # Stage the current tile (single cast, hoisted out of the tap loop).
    cur = x_cur_ref[...].astype(jnp.float32)
    if mask_cur:  # only needed when T % TT != 0 (last tile is partial)
        row = jax.lax.broadcasted_iota(jnp.int32, (TT, 1), 0)
        cur = jnp.where(it * TT + row < t_total, cur, 0.0)
    xext_ref[0:TT, :] = cur

    # Stage the context-1 halo rows of the NEXT tile; rows at/after T are the
    # zero right-padding of the original module (mask uses the semantic row
    # index, so the clamped/garbage last-tile halo is forced to zero).
    if C > 1:
        hrow = jax.lax.broadcasted_iota(jnp.int32, (C - 1, 1), 0)
        halo = x_halo_ref[0:C - 1, :].astype(jnp.float32)
        xext_ref[TT:TT + C - 1, :] = jnp.where(
            (it + 1) * TT + hrow < t_total, halo, 0.0)

    # Depthwise taps: out[t] = sum_k w[k] * x[t + k]   (all f32, VPU work).
    w = w_ref[...].astype(jnp.float32)                 # (C, LT), cast once
    acc_ref[...] = xext_ref[0:TT, :] * w[0:1, :]
    for k in range(1, C):
        acc_ref[...] += xext_ref[k:k + TT, :] * w[k:k + 1, :]
    o_ref[...] = acc_ref[...].astype(o_ref.dtype)


def lookahead_forward(x_tbf, weight_fc, context, *, lane_tile=1024,
                      time_tile=None):
    """x_tbf: (T, B, F), weight_fc: (F, context) -> (T, B, F)."""
    T, B, F = x_tbf.shape
    C = int(context)
    assert C > 0 and weight_fc.shape == (F, C)
    BF = B * F

    # Free reshape (contiguous collapse): keeps the feature axis lane-dense
    # and folds batch into the lane dimension too.  No transpose, no pad.
    x2 = x_tbf.reshape(T, BF)
    # w2[k, b*F + f] = weight[f, k]  (tiny array, built once).
    w2 = jnp.broadcast_to(jnp.transpose(weight_fc)[:, None, :],
                          (C, B, F)).reshape(C, BF)

    # Lane tiling: full BF if it fits, else a multiple-of-128 tile.
    LT = BF if BF <= lane_tile else lane_tile
    nl = pl.cdiv(BF, LT)

    # Halo rows = context-1 rounded up to a sublane multiple (>= 8).
    H = 8 * max(1, -(-(C - 1) // 8))

    # Time tiling: ~2 MiB input blocks, multiple of H so the halo block index
    # is exact, large enough to amortize per-step overhead.
    bytes_per_el = x_tbf.dtype.itemsize
    if time_tile is None:
        t_target = max(512, (2 << 20) // max(1, LT * bytes_per_el))
    else:
        t_target = max(H, int(time_tile))
    TT = max(H, (t_target // H) * H)
    if T <= TT:
        TT = T                       # single time tile (halo fully masked)
    nt = pl.cdiv(T, TT)

    n_halo_blocks = pl.cdiv(T, H)
    halo_stride = max(1, TT // H)    # exact when nt > 1 (TT % H == 0)
    mask_cur = (T % TT) != 0

    kernel = functools.partial(_lookahead_kernel, context=C, t_total=T,
                               t_tile=TT, mask_cur=mask_cur)

    cost = pl.CostEstimate(
        flops=2 * C * T * BF,
        transcendentals=0,
        bytes_accessed=int(2 * T * BF * bytes_per_el
                           + C * BF * w2.dtype.itemsize),
    )

    out2 = pl.pallas_call(
        kernel,
        out_shape=jax.ShapeDtypeStruct((T, BF), x_tbf.dtype),
        grid_spec=pltpu.PrefetchScalarGridSpec(
            num_scalar_prefetch=0,
            grid=(nl, nt),
            in_specs=[
                # current time tile
                pl.BlockSpec((TT, LT), lambda j, i: (i, j)),
                # halo: head of the next time tile (clamped on the last tile;
                # its contents are fully masked there)
                pl.BlockSpec(
                    (H, LT),
                    lambda j, i: (jnp.minimum((i + 1) * halo_stride,
                                              n_halo_blocks - 1), j)),
                # depthwise weights (block index constant in i -> stays
                # resident across the inner time loop)
                pl.BlockSpec((C, LT), lambda j, i: (0, j)),
            ],
            out_specs=pl.BlockSpec((TT, LT), lambda j, i: (i, j)),
            scratch_shapes=[
                pltpu.VMEM((TT + C - 1, LT), jnp.float32),  # staged x (ext)
                pltpu.VMEM((TT, LT), jnp.float32),          # f32 accumulator
            ],
        ),
        compiler_params=pltpu.CompilerParams(
            dimension_semantics=("parallel", "parallel")),
        cost_estimate=cost,
    )(x2, x2, w2)

    # Free reshape back to (T, B, F) — same layout as the PyTorch module.
    return out2.reshape(T, B, F)


def lookahead_reference(x_tbf, weight_fc, context):
    """Pure-JAX reference of the PyTorch forward, for validation."""
    T, B, F = x_tbf.shape
    x_pad = jnp.pad(x_tbf, ((0, context - 1), (0, 0), (0, 0)))
    out = jnp.zeros((T, B, F), dtype=jnp.float32)
    for k in range(context):
        out = out + (x_pad[k:k + T].astype(jnp.float32)
                     * weight_fc[:, k][None, None, :])
    return out.astype(x_tbf.dtype)


if __name__ == "__main__":
    key = jax.random.PRNGKey(0)

    # Case 1: small shapes consistent with the module (seq=8, batch=2, feat=32).
    T, B, F = 8, 2, 32
    context = 3
    kx, kw, kx2, kw2 = jax.random.split(key, 4)
    x = jax.random.normal(kx, (T, B, F), dtype=jnp.float32)
    bound = 1.0 / (context ** 0.5)
    w = jax.random.uniform(kw, (F, context), minval=-bound, maxval=bound,
                           dtype=jnp.float32)
    out = jax.block_until_ready(lookahead_forward(x, w, context))
    ref = lookahead_reference(x, w, context)
    assert out.shape == (T, B, F)
    assert jnp.allclose(out, ref, atol=1e-5, rtol=1e-5)

    # Case 2: still small, but forces the multi-tile path (partial last time
    # tile + halo + zero-tail masking) with an explicit small time tile.
    T2, B2, F2, context2 = 40, 2, 32, 4
    x2 = jax.random.normal(kx2, (T2, B2, F2), dtype=jnp.float32)
    bound2 = 1.0 / (context2 ** 0.5)
    w2 = jax.random.uniform(kw2, (F2, context2), minval=-bound2, maxval=bound2,
                            dtype=jnp.float32)
    out2 = jax.block_until_ready(
        lookahead_forward(x2, w2, context2, time_tile=16))
    ref2 = lookahead_reference(x2, w2, context2)
    assert out2.shape == (T2, B2, F2)
    assert jnp.allclose(out2, ref2, atol=1e-5, rtol=1e-5)

    print("KERNEL_OK")
</pallas_src>

<mosaic_0001>
module attributes {stable_mosaic.version = 11 : i64} {
  func.func @_lookahead_kernel(%arg0: i32, %arg1: i32, %arg2: memref<8x64xf32, #tpu.memory_space<vmem>>, %arg3: memref<8x64xf32, #tpu.memory_space<vmem>>, %arg4: memref<3x64xf32, #tpu.memory_space<vmem>>, %arg5: memref<8x64xf32, #tpu.memory_space<vmem>>, %arg6: memref<10x64xf32, #tpu.memory_space<vmem>>, %arg7: memref<8x64xf32, #tpu.memory_space<vmem>>) attributes {dimension_semantics = [#tpu.dimension_semantics<parallel>, #tpu.dimension_semantics<parallel>], iteration_bounds = array<i64: 1, 1>, scalar_prefetch = 0 : i64, scratch_operands = 2 : i64, tpu.core_type = #tpu.core_type<tc>, window_params = [{transform_indices = @transform_0, window_bounds = array<i64: 8, 64>}, {transform_indices = @transform_1, window_bounds = array<i64: 8, 64>}, {transform_indices = @transform_2, window_bounds = array<i64: 3, 64>}, {transform_indices = @transform_3, window_bounds = array<i64: 8, 64>}]} {
    %c0 = arith.constant 0 : index
    %c0_0 = arith.constant 0 : index
    %0 = vector.load %arg2[%c0, %c0_0] : memref<8x64xf32, #tpu.memory_space<vmem>>, vector<8x64xf32>
    %c0_1 = arith.constant 0 : index
    %c0_2 = arith.constant 0 : index
    %1 = vector.load %arg6[%c0_1, %c0_2] : memref<10x64xf32, #tpu.memory_space<vmem>>, vector<8x64xf32>
    tpu.vector_store %arg6[%c0_1, %c0_2], %0 {strides = array<i32>} : memref<10x64xf32, #tpu.memory_space<vmem>>, vector<8x64xf32>,
    %2 = tpu.iota {dimensions = array<i32: 0>} : vector<2x1xi32>
    %c0_3 = arith.constant 0 : index
    %c0_4 = arith.constant 0 : index
    %3 = vector.load %arg3[%c0_3, %c0_4] : memref<8x64xf32, #tpu.memory_space<vmem>>, vector<2x64xf32>
    %c1_i32 = arith.constant 1 : i32
    %4 = arith.addi %arg1, %c1_i32 : i32
    %c8_i32 = arith.constant 8 : i32
    %5 = arith.muli %4, %c8_i32 : i32
    %6 = vector.broadcast %5 : i32 to vector<2x1xi32>
    %7 = arith.addi %6, %2 : vector<2x1xi32>
    %c8_i32_5 = arith.constant 8 : i32
    %8 = vector.broadcast %c8_i32_5 : i32 to vector<2x1xi32>
    %9 = arith.cmpi slt, %7, %8 : vector<2x1xi32>
    %cst = arith.constant 0.000000e+00 : f32
    %10 = vector.shape_cast %9 : vector<2x1xi1> to vector<2x1xi1>
    %11 = vector.broadcast %10 : vector<2x1xi1> to vector<2x64xi1>
    %12 = vector.broadcast %cst : f32 to vector<2x64xf32>
    %13 = arith.select %11, %3, %12 : vector<2x64xi1>, vector<2x64xf32>
    %c8 = arith.constant 8 : index
    %c0_6 = arith.constant 0 : index
    %14 = vector.load %arg6[%c8, %c0_6] : memref<10x64xf32, #tpu.memory_space<vmem>>, vector<2x64xf32>
    tpu.vector_store %arg6[%c8, %c0_6], %13 {strides = array<i32>} : memref<10x64xf32, #tpu.memory_space<vmem>>, vector<2x64xf32>,
    %c0_7 = arith.constant 0 : index
    %c0_8 = arith.constant 0 : index
    %15 = vector.load %arg4[%c0_7, %c0_8] : memref<3x64xf32, #tpu.memory_space<vmem>>, vector<3x64xf32>
    %c0_9 = arith.constant 0 : index
    %c0_10 = arith.constant 0 : index
    %16 = vector.load %arg6[%c0_9, %c0_10] : memref<10x64xf32, #tpu.memory_space<vmem>>, vector<8x64xf32>
    %17 = vector.extract_strided_slice %15 {offsets = [0, 0], sizes = [1, 64], strides = [1, 1]} : vector<3x64xf32> to vector<1x64xf32>
    %18 = vector.broadcast %17 : vector<1x64xf32> to vector<8x64xf32>
    %19 = arith.mulf %16, %18 : vector<8x64xf32>
    %c0_11 = arith.constant 0 : index
    %c0_12 = arith.constant 0 : index
    %20 = vector.load %arg7[%c0_11, %c0_12] : memref<8x64xf32, #tpu.memory_space<vmem>>, vector<8x64xf32>
    tpu.vector_store %arg7[%c0_11, %c0_12], %19 {strides = array<i32>} : memref<8x64xf32, #tpu.memory_space<vmem>>, vector<8x64xf32>,
    %c0_13 = arith.constant 0 : index
    %c0_14 = arith.constant 0 : index
    %21 = vector.load %arg7[%c0_13, %c0_14] : memref<8x64xf32, #tpu.memory_space<vmem>>, vector<8x64xf32>
    %c1 = arith.constant 1 : index
    %c0_15 = arith.constant 0 : index
    %22 = vector.load %arg6[%c1, %c0_15] : memref<10x64xf32, #tpu.memory_space<vmem>>, vector<8x64xf32>
    %23 = vector.extract_strided_slice %15 {offsets = [1, 0], sizes = [1, 64], strides = [1, 1]} : vector<3x64xf32> to vector<1x64xf32>
    %24 = vector.broadcast %23 : vector<1x64xf32> to vector<8x64xf32>
    %25 = arith.mulf %22, %24 : vector<8x64xf32>
    %26 = arith.addf %21, %25 : vector<8x64xf32>
    %c0_16 = arith.constant 0 : index
    %c0_17 = arith.constant 0 : index
    %27 = vector.load %arg7[%c0_16, %c0_17] : memref<8x64xf32, #tpu.memory_space<vmem>>, vector<8x64xf32>
    tpu.vector_store %arg7[%c0_16, %c0_17], %26 {strides = array<i32>} : memref<8x64xf32, #tpu.memory_space<vmem>>, vector<8x64xf32>,
    %c0_18 = arith.constant 0 : index
    %c0_19 = arith.constant 0 : index
    %28 = vector.load %arg7[%c0_18, %c0_19] : memref<8x64xf32, #tpu.memory_space<vmem>>, vector<8x64xf32>
    %c2 = arith.constant 2 : index
    %c0_20 = arith.constant 0 : index
    %29 = vector.load %arg6[%c2, %c0_20] : memref<10x64xf32, #tpu.memory_space<vmem>>, vector<8x64xf32>
    %30 = vector.extract_strided_slice %15 {offsets = [2, 0], sizes = [1, 64], strides = [1, 1]} : vector<3x64xf32> to vector<1x64xf32>
    %31 = vector.broadcast %30 : vector<1x64xf32> to vector<8x64xf32>
    %32 = arith.mulf %29, %31 : vector<8x64xf32>
    %33 = arith.addf %28, %32 : vector<8x64xf32>
    %c0_21 = arith.constant 0 : index
    %c0_22 = arith.constant 0 : index
    %34 = vector.load %arg7[%c0_21, %c0_22] : memref<8x64xf32, #tpu.memory_space<vmem>>, vector<8x64xf32>
    tpu.vector_store %arg7[%c0_21, %c0_22], %33 {strides = array<i32>} : memref<8x64xf32, #tpu.memory_space<vmem>>, vector<8x64xf32>,
    %c0_23 = arith.constant 0 : index
    %c0_24 = arith.constant 0 : index
    %35 = vector.load %arg7[%c0_23, %c0_24] : memref<8x64xf32, #tpu.memory_space<vmem>>, vector<8x64xf32>
    %c0_25 = arith.constant 0 : index
    %c0_26 = arith.constant 0 : index
    %36 = vector.load %arg5[%c0_25, %c0_26] : memref<8x64xf32, #tpu.memory_space<vmem>>, vector<8x64xf32>
    tpu.vector_store %arg5[%c0_25, %c0_26], %35 {strides = array<i32>} : memref<8x64xf32, #tpu.memory_space<vmem>>, vector<8x64xf32>,
    return
  }
  func.func @transform_0(%arg0: i32, %arg1: i32) -> (i32, i32) {
    %c0_i32 = arith.constant 0 : i32
    return %arg1, %arg0 : i32, i32
  }
  func.func @transform_1(%arg0: i32, %arg1: i32) -> (i32, i32) {
    %c1_i32 = arith.constant 1 : i32
    %0 = arith.addi %arg1, %c1_i32 : i32
    %c1_i32_0 = arith.constant 1 : i32
    %1 = arith.muli %0, %c1_i32_0 : i32
    %c0_i32 = arith.constant 0 : i32
    %2 = arith.minsi %1, %c0_i32 : i32
    %c0_i32_1 = arith.constant 0 : i32
    return %2, %arg0 : i32, i32
  }
  func.func @transform_2(%arg0: i32, %arg1: i32) -> (i32, i32) {
    %c0_i32 = arith.constant 0 : i32
    %c0_i32_0 = arith.constant 0 : i32
    return %c0_i32, %arg0 : i32, i32
  }
  func.func @transform_3(%arg0: i32, %arg1: i32) -> (i32, i32) {
    %c0_i32 = arith.constant 0 : i32
    return %arg1, %arg0 : i32, i32
  }
}

</mosaic_0001>

<bundles_post_ra>
// kernel: tpu_custom_call.1
= control target key start
LH: loop header
LB: loop body
LE: loop exit
PB: predicated region body
PF: predicated region fallthrough
CT: control target
= control target key end

     0   :  { %8 = vsyncpa [#allocation5], 0  ;;  %s253_s0 = inlined_call_operand.hbm [shape: f32[8,64], index: 0, kind: input, shape index: {}]   ;;  %s254_s1 = inlined_call_operand.hbm [shape: f32[8,64], index: 1, kind: input, shape index: {}]   ;;  %s255_s2 = inlined_call_operand.vmem [shape: f32[3,64], index: 2, kind: input, shape index: {}]   ;;  %s256_s3 = inlined_call_operand.hbm [shape: f32[8,64], index: 3, kind: output, shape index: {}]  }
   0x1   :  { %9 = vsyncpa [#allocation8], 0 }
   0x2   :  { %10 = vsyncpa [#allocation6], 0  ;;  %s185_s12 = smov [#allocation4]   ;;  %s186_s14 = smov [#allocation7]  }
   0x3   :  { %s17_s13 = sshll.u32 %s185_s12, 4  ;;  %s32_s15 = sshll.u32 %s186_s14, 4  ;;  %s18_s13 = int_to_ptr.vmem [resolvable:$true] %s17_s13  ;;  %s33_s15 = int_to_ptr.vmem [resolvable:$true] %s32_s15 }
   0x4   :  { %s113_s18 = scalar_lea.hbm %s253_s0, 128 }
   0x5   :  { %p114_p0 = scmp.ne.s32.totalorder %s253_s0, %s113_s18  ;;  %p117_p1 = scmp.lt.u32.totalorder %s113_s18, %s253_s0 }
   0x7   :  { %p119_p2 = pnand %p117_p1, %p114_p0 }
   0x9   :  { %122 = shalt.err (!%p119_p2)
}
   0xa   :  { %s123_s23 = scalar_lea.vmem %s18_s13, 128  ;;  %p128_p4 = scmp.lt.s32.totalorder %s18_s13, %s18_s13 }
   0xb   :  { %p124_p3 = scmp.ne.s32.totalorder %s18_s13, %s123_s23  ;;  %p129_p5 = scmp.lt.s32.totalorder %s123_s23, %s123_s23 }
   0xd   :  { %p130_p6 = por %p129_p5, %p128_p4 }
   0xf   :  { %p131_p7 = pnand %p130_p6, %p124_p3 }
  0x11   :  { %134 = shalt.err (!%p131_p7)
}
  0x12   :  { %20 = dma.hbm_to_vmem [thread:$0]  %s253_s0, 128, %s18_s13, [#allocation5]  }
  0x13   :  { %s135_s28 = scalar_lea.hbm %s254_s1, 128 }
  0x14   :  { %p136_p8 = scmp.ne.s32.totalorder %s254_s1, %s135_s28  ;;  %p139_p9 = scmp.lt.u32.totalorder %s135_s28, %s254_s1 }
  0x16   :  { %p141_p10 = pnand %p139_p9, %p136_p8 }
  0x18   :  { %144 = shalt.err (!%p141_p10)
}
  0x19   :  { %s145_s6 = scalar_lea.vmem %s33_s15, 128  ;;  %p150_p12 = scmp.lt.s32.totalorder %s33_s15, %s33_s15 }
  0x1a   :  { %p146_p11 = scmp.ne.s32.totalorder %s33_s15, %s145_s6  ;;  %p151_p13 = scmp.lt.s32.totalorder %s145_s6, %s145_s6 }
  0x1c   :  { %p152_p0 = por %p151_p13, %p150_p12 }
  0x1e   :  { %p153_p1 = pnand %p152_p0, %p146_p11 }
  0x20   :  { %156 = shalt.err (!%p153_p1)
}
  0x21   :  { %35 = dma.hbm_to_vmem [thread:$0]  %s254_s1, 128, %s33_s15, [#allocation8]  }
  0x22   :  { %179 = dma.done.wait [#allocation5], 128  }
  0x23   :  { %180 = vsyncadd [#allocation5], 4294967168 }
  0x24   :  { %181 = dma.done.wait [#allocation8], 128  }
  0x25   :  { %182 = vsyncadd [#allocation8], 4294967168  ;;  %vm61_vm0 = vcmask 517120   ;;  %v65_v0 = vlaneseq  ;;  %v187_v1 = vmov 0.0   ;;  %vm48_vm1 = vcmask 523264   ;;  %v47_v3 = vld [vmem:[#allocation4] sm:$0xff] }
  0x26   :  { %62 = vst.msk [vmem:[#allocation2 + $0x8] sm:$0x3] %vm61_vm0, %v187_v1  ;;  %v63_v5 = vld [vmem:[%s255_s2] sm:$0x7]  ;;  %s188_s1 = smov [#allocation9]  }
  0x27   :  { %v66_v2 = vshrl.u32 %v65_v0, 7  ;;  %49 = vst.msk [vmem:[#allocation2] sm:$0xff] %vm48_vm1, %v47_v3  ;;  %s97_s2 = sshll.u32 %s188_s1, 4  ;;  %s98_s2 = int_to_ptr.vmem [resolvable:$true] %s97_s2 }
  0x28   :  { %s157_s10 = scalar_lea.vmem %s98_s2, 128  ;;  %p162_p3 = scmp.lt.s32.totalorder %s98_s2, %s98_s2 }
  0x29   :  { %v67_v4 = vsub.s32 0, %v66_v2  ;;  %v75_v9 = vsub.s32 1, %v66_v2  ;;  %v84_v14 = vsub.s32 2, %v66_v2  ;;  %p158_p2 = scmp.ne.s32.totalorder %s98_s2, %s157_s10  ;;  %p163_p4 = scmp.lt.s32.totalorder %s157_s10, %s157_s10 }
  0x2b   :  { %v68_v6 = vrot.slane %v63_v5, %v67_v4  ;;  %v76_v10 = vrot.slane %v63_v5, %v75_v9  ;;  %v85_v16 = vrot.slane %v63_v5, %v84_v14  ;;  %p164_p5 = por %p163_p4, %p162_p3 }
  0x2d   :  { %p165_p6 = pnand %p164_p5, %p158_p2 }
  0x2e   :  { %v64_v7 = vld [vmem:[#allocation2] sm:$0xff] }
  0x2f   :  { %v69_v8 = vmul.f32 %v68_v6, %v64_v7  ;;  %v72_v11 = vld [vmem:[#allocation2 + $0x1] sm:$0xff] }
  0x30   :  { %v77_v12 = vmul.f32 %v76_v10, %v72_v11  ;;  %v81_v17 = vld [vmem:[#allocation2 + $0x2] sm:$0xff] }
  0x31   :  { %70 = vst.msk [vmem:[#allocation3] sm:$0xff] %vm48_vm1, %v69_v8  ;;  %v86_v18 = vmul.f32 %v85_v16, %v81_v17 }
  0x38   :  { %v71_v13 = vld [vmem:[#allocation3] sm:$0xff] }
  0x39   :  { %v78_v15 = vadd.f32 %v77_v12, %v71_v13 }
  0x3b   :  { %79 = vst.msk [vmem:[#allocation3] sm:$0xff] %vm48_vm1, %v78_v15 }
  0x42   :  { %v80_v19 = vld [vmem:[#allocation3] sm:$0xff] }
  0x43   :  { %v87_v20 = vadd.f32 %v86_v18, %v80_v19 }
  0x45   :  { %88 = vst.msk [vmem:[#allocation3] sm:$0xff] %vm48_vm1, %v87_v20 }
  0x4c   :  { %v89_v21 = vld [vmem:[#allocation3] sm:$0xff] }
  0x4d   :  { %90 = vst.msk [vmem:[#allocation9] sm:$0xff] %vm48_vm1, %v89_v21 }
  0x4e   :  { %168 = shalt.err (!%p165_p6)
}
  0x4f   :  { %s169_s13 = scalar_lea.hbm %s256_s3, 128 }
  0x50   :  { %p170_p7 = scmp.ne.s32.totalorder %s256_s3, %s169_s13  ;;  %p173_p8 = scmp.lt.u32.totalorder %s169_s13, %s256_s3 }
  0x52   :  { %p175_p9 = pnand %p173_p8, %p170_p7 }
  0x54   :  { %178 = shalt.err (!%p175_p9)
}
  0x55   :  { %100 = dma.vmem_to_hbm [thread:$0]  %s98_s2, 128, %s256_s3, [#allocation6]  }
  0x56   :  { %183 = dma.done.wait [#allocation6], 128  }
  0x57   :  { %184 = vsyncadd [#allocation6], 4294967168 }
  0x58   :  { %104 = vsyncpa [#allocation5], 1 }
  0x59   :  { %105 = vsyncpa [#allocation8], 1 }
  0x5a   :  { %106 = vsyncpa [#allocation6], 1 }

</bundles_post_ra>
